<compile_context>
chip_gen: v6e
topology: v6e:2x2x1
jax: 0.10.0
libtpu: 0.0.40
codegen_flags: <defaults>
</compile_context>

<pallas_src>
import jax
import jax.numpy as jnp
from jax.experimental import pallas as pl
from jax.experimental.pallas import tpu as pltpu

_TARGET_GRID_STEPS = 8  # keep >=2 (ideally ~8) steps so v7x's 2 TCs both work


def _round_up(a, b):
    return (a + b - 1) // b * b


def _sublane(dtype):
    # min second-to-last block dim: 8 (32-bit), 16 (16-bit), 32 (8-bit)
    return max(8, 32 // jnp.dtype(dtype).itemsize)


def _split_linear_kernel(x_ref, w_ref, b_ref, o_ref):
    # x_ref: (tm, S*Din)   w_ref: (S, Din, Dout)   b_ref: (1, S*Dout)
    # o_ref: (tm, S*Dout)
    S, Din, Dout = w_ref.shape
    outs = []
    for k in range(S):  # static unroll; S is small
        xk = x_ref[:, k * Din:(k + 1) * Din]
        outs.append(jnp.dot(xk, w_ref[k], preferred_element_type=jnp.float32))
    acc = outs[0] if S == 1 else jnp.concatenate(outs, axis=-1)
    # f32 bias add, single cast at the (full-width) store.
    o_ref[...] = (acc + b_ref[...].astype(jnp.float32)).astype(o_ref.dtype)


def split_linear(x, weight, bias, *, tm=None, compute_dtype=jnp.bfloat16,
                 out_dtype=None):
    """x: (B, T, in_split*in_dim); weight: (in_split, in_dim, out_dim);
    bias: (1, 1, in_split, out_dim).  Returns (B, T, in_split*out_dim).

    compute_dtype: dtype of the matmul operands (default bf16; accumulation is
    always f32 and the bias is added in f32 before the final cast).
    out_dtype: output dtype (defaults to x.dtype).
    """
    B, T, D = x.shape
    S, Din, Dout = weight.shape
    assert D == S * Din
    BT = B * T
    N = S * Dout
    out_dtype = x.dtype if out_dtype is None else jnp.dtype(out_dtype)
    cdt = x.dtype if compute_dtype is None else jnp.dtype(compute_dtype)

    # ---- Layout plumbing: pure reshapes / dtype casts only (no transposes,
    # ---- no block-diagonal materialization, no padding of x). ----
    x_flat = x.reshape(BT, D)
    if x_flat.dtype != cdt:
        x_flat = x_flat.astype(cdt)
    w = weight if weight.dtype == cdt else weight.astype(cdt)
    b_flat = bias.reshape(1, N)
    if b_flat.dtype != jnp.float32:
        b_flat = b_flat.astype(jnp.float32)

    # ---- Row tiling: dtype-correct sublane rounding; size tiles so the grid
    # ---- has ~_TARGET_GRID_STEPS steps (megacore) but caps at 2048 rows. ----
    sub = max(_sublane(cdt), _sublane(out_dtype))
    if tm is None:
        tm = min(2048, max(sub, _round_up(pl.cdiv(BT, _TARGET_GRID_STEPS), sub)))
    tm = max(sub, _round_up(min(tm, _round_up(BT, sub)), sub))
    grid_m = pl.cdiv(BT, tm)  # ragged last block handled by Pallas (no pad)

    # ---- VMEM limit from the actual footprint (+25% headroom). ----
    # x/out blocks are double-buffered by the pipeline; weight/bias are
    # grid-constant (tiny per split) and counted at 2 buffers to be safe.
    footprint = (2 * tm * D * jnp.dtype(cdt).itemsize
                 + 2 * tm * N * jnp.dtype(out_dtype).itemsize
                 + 2 * S * Din * Dout * jnp.dtype(cdt).itemsize
                 + 2 * N * 4)
    vmem_limit = max(int(footprint * 1.25), 32 * 1024 * 1024)

    out = pl.pallas_call(
        _split_linear_kernel,
        out_shape=jax.ShapeDtypeStruct((BT, N), out_dtype),
        grid_spec=pltpu.PrefetchScalarGridSpec(
            num_scalar_prefetch=0,
            grid=(grid_m,),
            in_specs=[
                pl.BlockSpec((tm, D), lambda i: (i, 0)),
                pl.BlockSpec((S, Din, Dout), lambda i: (0, 0, 0)),  # resident
                pl.BlockSpec((1, N), lambda i: (0, 0)),             # resident
            ],
            out_specs=pl.BlockSpec((tm, N), lambda i: (i, 0)),
        ),
        compiler_params=pltpu.CompilerParams(
            dimension_semantics=("parallel",),
            vmem_limit_bytes=vmem_limit,
        ),
    )(x_flat, w, b_flat)

    return out.reshape(B, T, N)


def init_split_linear_params(key, in_dim, in_split, out_dim, dtype=jnp.float32):
    """Deterministic init matching nn.init.uniform_(-in_dim**-0.5, in_dim**-0.5).
    For in_split == 1 the same (1, in_dim, out_dim) parameterization is
    mathematically identical to nn.Linear's y = x @ W.T + b."""
    bound = in_dim ** (-0.5)
    kw, kb = jax.random.split(key)
    weight = jax.random.uniform(kw, (in_split, in_dim, out_dim), dtype,
                                minval=-bound, maxval=bound)
    bias = jax.random.uniform(kb, (1, 1, in_split, out_dim), dtype,
                              minval=-bound, maxval=bound)
    return weight, bias


def _reference(x, weight, bias):
    B, T, _ = x.shape
    S, Din, Dout = weight.shape
    xr = x.reshape(B, T, S, Din)
    ref = jnp.einsum('btkm,kmn->btkn', xr, weight) + bias.reshape(1, 1, S, Dout)
    return ref.reshape(B, T, S * Dout)


if __name__ == "__main__":
    # Small shapes consistent with the module's forward: (batch, seq, split*in_dim)
    B, T = 2, 8
    in_dim, in_split, out_dim = 32, 3, 16

    key = jax.random.PRNGKey(0)
    kx, kp = jax.random.split(key)
    x = jax.random.normal(kx, (B, T, in_split * in_dim), jnp.float32)
    weight, bias = init_split_linear_params(kp, in_dim, in_split, out_dim)
    ref = _reference(x, weight, bias)

    # f32 operand path (strict correctness check).
    out_f32 = jax.block_until_ready(
        split_linear(x, weight, bias, compute_dtype=jnp.float32))
    assert out_f32.shape == (B, T, in_split * out_dim)
    assert jnp.allclose(out_f32, ref, atol=1e-5, rtol=1e-5)

    # Ragged B*T (not a multiple of the row tile): exercises the partial last
    # block — no jnp.pad of x, no output slice.
    B2, T2 = 2, 37
    x2 = jax.random.normal(jax.random.PRNGKey(1), (B2, T2, in_split * in_dim),
                           jnp.float32)
    out2 = jax.block_until_ready(
        split_linear(x2, weight, bias, compute_dtype=jnp.float32))
    ref2 = _reference(x2, weight, bias)
    assert out2.shape == (B2, T2, in_split * out_dim)
    assert jnp.allclose(out2, ref2, atol=1e-5, rtol=1e-5)

    # Default path: bf16 operands, f32 accumulate + f32 bias add, f32 output.
    out_def = jax.block_until_ready(split_linear(x, weight, bias))
    assert out_def.shape == (B, T, in_split * out_dim)
    assert jnp.allclose(out_def, ref, atol=5e-2, rtol=5e-2)

    print("KERNEL_OK")
</pallas_src>

<mosaic_0001>
module attributes {stable_mosaic.version = 11 : i64} {
  func.func @_split_linear_kernel(%arg0: i32, %arg1: memref<8x96xf32, #tpu.memory_space<vmem>>, %arg2: memref<3x32x16xf32, #tpu.memory_space<vmem>>, %arg3: memref<1x48xf32, #tpu.memory_space<vmem>>, %arg4: memref<8x48xf32, #tpu.memory_space<vmem>>) attributes {dimension_semantics = [#tpu.dimension_semantics<parallel>], iteration_bounds = array<i64: 2>, scalar_prefetch = 0 : i64, scratch_operands = 0 : i64, tpu.core_type = #tpu.core_type<tc>, window_params = [{transform_indices = @transform_0, window_bounds = array<i64: 8, 96>}, {pipeline_mode = #tpu.pipeline_mode<synchronous>, transform_indices = @transform_1, window_bounds = array<i64: 3, 32, 16>}, {pipeline_mode = #tpu.pipeline_mode<synchronous>, transform_indices = @transform_2, window_bounds = array<i64: 1, 48>}, {transform_indices = @transform_3, window_bounds = array<i64: 8, 48>}]} {
    %c0 = arith.constant 0 : index
    %c0_0 = arith.constant 0 : index
    %0 = vector.load %arg1[%c0, %c0_0] : memref<8x96xf32, #tpu.memory_space<vmem>>, vector<8x32xf32>
    %c0_1 = arith.constant 0 : index
    %c0_2 = arith.constant 0 : index
    %c0_3 = arith.constant 0 : index
    %1 = vector.load %arg2[%c0_1, %c0_2, %c0_3] : memref<3x32x16xf32, #tpu.memory_space<vmem>>, vector<1x32x16xf32>
    %2 = vector.shape_cast %1 : vector<1x32x16xf32> to vector<32x16xf32>
    %cst = arith.constant dense<0.000000e+00> : vector<8x16xf32>
    %3 = tpu.matmul %0, %2, %cst {dimension_numbers = #tpu.dot_dimension_numbers<[1], [0], [0], [1], [0, 0, 1, 1], [], []>} : vector<8x32xf32>, vector<32x16xf32>, vector<8x16xf32> -> vector<8x16xf32>
    %c0_4 = arith.constant 0 : index
    %c32 = arith.constant 32 : index
    %4 = vector.load %arg1[%c0_4, %c32] : memref<8x96xf32, #tpu.memory_space<vmem>>, vector<8x32xf32>
    %c1 = arith.constant 1 : index
    %c0_5 = arith.constant 0 : index
    %c0_6 = arith.constant 0 : index
    %5 = vector.load %arg2[%c1, %c0_5, %c0_6] : memref<3x32x16xf32, #tpu.memory_space<vmem>>, vector<1x32x16xf32>
    %6 = vector.shape_cast %5 : vector<1x32x16xf32> to vector<32x16xf32>
    %cst_7 = arith.constant dense<0.000000e+00> : vector<8x16xf32>
    %7 = tpu.matmul %4, %6, %cst_7 {dimension_numbers = #tpu.dot_dimension_numbers<[1], [0], [0], [1], [0, 0, 1, 1], [], []>} : vector<8x32xf32>, vector<32x16xf32>, vector<8x16xf32> -> vector<8x16xf32>
    %c0_8 = arith.constant 0 : index
    %c64 = arith.constant 64 : index
    %8 = vector.load %arg1[%c0_8, %c64] : memref<8x96xf32, #tpu.memory_space<vmem>>, vector<8x32xf32>
    %c2 = arith.constant 2 : index
    %c0_9 = arith.constant 0 : index
    %c0_10 = arith.constant 0 : index
    %9 = vector.load %arg2[%c2, %c0_9, %c0_10] : memref<3x32x16xf32, #tpu.memory_space<vmem>>, vector<1x32x16xf32>
    %10 = vector.shape_cast %9 : vector<1x32x16xf32> to vector<32x16xf32>
    %cst_11 = arith.constant dense<0.000000e+00> : vector<8x16xf32>
    %11 = tpu.matmul %8, %10, %cst_11 {dimension_numbers = #tpu.dot_dimension_numbers<[1], [0], [0], [1], [0, 0, 1, 1], [], []>} : vector<8x32xf32>, vector<32x16xf32>, vector<8x16xf32> -> vector<8x16xf32>
    %12 = tpu.concatenate %3, %7, %11 in 1 : vector<8x16xf32>, vector<8x16xf32>, vector<8x16xf32> -> vector<8x48xf32>
    %c0_12 = arith.constant 0 : index
    %c0_13 = arith.constant 0 : index
    %13 = vector.load %arg3[%c0_12, %c0_13] : memref<1x48xf32, #tpu.memory_space<vmem>>, vector<1x48xf32>
    %14 = vector.broadcast %13 : vector<1x48xf32> to vector<8x48xf32>
    %15 = arith.addf %12, %14 : vector<8x48xf32>
    %c0_14 = arith.constant 0 : index
    %c0_15 = arith.constant 0 : index
    %16 = vector.load %arg4[%c0_14, %c0_15] : memref<8x48xf32, #tpu.memory_space<vmem>>, vector<8x48xf32>
    tpu.vector_store %arg4[%c0_14, %c0_15], %15 {strides = array<i32>} : memref<8x48xf32, #tpu.memory_space<vmem>>, vector<8x48xf32>,
    return
  }
  func.func @transform_0(%arg0: i32) -> (i32, i32) {
    %c0_i32 = arith.constant 0 : i32
    %c0_i32_0 = arith.constant 0 : i32
    return %arg0, %c0_i32 : i32, i32
  }
  func.func @transform_1(%arg0: i32) -> (i32, i32, i32) {
    %c0_i32 = arith.constant 0 : i32
    %c0_i32_0 = arith.constant 0 : i32
    %c0_i32_1 = arith.constant 0 : i32
    %c0_i32_2 = arith.constant 0 : i32
    return %c0_i32, %c0_i32_0, %c0_i32_1 : i32, i32, i32
  }
  func.func @transform_2(%arg0: i32) -> (i32, i32) {
    %c0_i32 = arith.constant 0 : i32
    %c0_i32_0 = arith.constant 0 : i32
    %c0_i32_1 = arith.constant 0 : i32
    return %c0_i32, %c0_i32_0 : i32, i32
  }
  func.func @transform_3(%arg0: i32) -> (i32, i32) {
    %c0_i32 = arith.constant 0 : i32
    %c0_i32_0 = arith.constant 0 : i32
    return %arg0, %c0_i32 : i32, i32
  }
}

</mosaic_0001>

<bundles_post_ra>
// kernel: tpu_custom_call.1
= control target key start
LH: loop header
LB: loop body
LE: loop exit
PB: predicated region body
PF: predicated region fallthrough
CT: control target
= control target key end

     0   :  { %8 = vsyncpa [#allocation3], 0  ;;  %s834_s0 = inlined_call_operand.vmem [shape: f32[16,96], index: 0, kind: input, shape index: {}]   ;;  %s835_s1 = inlined_call_operand.vmem [shape: f32[3,32,16], index: 1, kind: input, shape index: {}]   ;;  %s836_s2 = inlined_call_operand.vmem [shape: f32[1,48], index: 2, kind: input, shape index: {}]   ;;  %s837_s3 = inlined_call_operand.hbm [shape: f32[16,48], index: 3, kind: output, shape index: {}]  }
   0x1   :  { %10 = vsyncpa [#allocation3 + $0x1], 0  ;;  %s701_s12 = smov 0   ;;  %s703_s13 = smov 0  }
   0x2   :  { %s705_s14 = smov 0   ;;  %s707_s15 = smov 0  }
   0x3 LB: > { %s722_s16 = sadd.s32 4294967295, %s672_s15   ;;  %s497_s17 = sadd.s32 4294967294, %s672_s15   ;;  %s672_s15 = sphi %s707_s15, %s843_s15   ;;  %s668_s14 = sphi %s705_s14, %s842_s14   ;;  %s664_s13 = sphi %s703_s13, %s841_s13   ;;  %s660_s12 = sphi %s701_s12, %s840_s12  }
   0x4   : > { %s726_s18 = sadd.s32 1, %s672_s15   ;;  %s91_s19 = sadd.s32 1, %s668_s14 }
   0x5   : > { %s88_s20 = ssub.s32 %s672_s15, %s726_s18  ;;  %p101_p0 = scmp.ne.s32.totalorder %s668_s14, %s664_s13 }
   0x6   : > { %p89_p1 = scmp.eq.s32.totalorder %s88_s20, 0  ;;  %p102_p2 = scmp.eq.s32.totalorder %s722_s16, 1 }
   0x7   : > { %p107_p3 = scmp.ne.s32.totalorder %s664_s13, %s660_s12  ;;  %p108_p4 = scmp.eq.s32.totalorder %s497_s17, 1 }
   0x8   : > { %s737_s21 = scalar_select %p89_p1, %s668_s14, %s91_s19  }
   0x9   : > { %p739_p5 = por %p102_p2, %p101_p0  ;;  %p743_p6 = por %p108_p4, %p107_p3 }
   0xa   : > { %p500_p7 = scmp.ge.s32.totalorder %s672_s15, 1  ;;  %p139_p8 = scmp.lt.s32.totalorder %s672_s15, 3 }
   0xc   : > { %p140_p9 = pnand %p500_p7, %p139_p8 }
   0xd   : > { %p162_p10 = scmp.lt.s32.totalorder (!%p140_p9), %s722_s16, 1  ;;  %s676_s25 = smov (!%p140_p9), 96  }
   0xe   : > { %143 = sbr.rel (%p140_p9) target bundleno = 469 (0x1d5), region = 32  ;;  %s677_s5 = smov (!%p140_p9), 64  }
   0xf   : > { %s678_s10 = smov (!%p140_p9), 16   ;;  %s159_s17 = sand.u32 (!%p140_p9), 1, %s664_s13  }
  0x10   : > { %s501_s19 = sshll.u32 (!%p140_p9), %s159_s17, 3  ;;  %s425_s4 = scalar_lea.sflag (!%p140_p9), [#allocation3], %s159_s17 }
  0x11   : > { %s161_s26 = scalar_lea.vmem (!%p140_p9), [#allocation2], %s501_s19 }
  0x12   : > { %s438_s27 = sshll.u32 (!%p140_p9), %s161_s26, 4  ;;  %s439_s27 = int_to_ptr.vmem [resolvable:$true] %s438_s27 }
  0x13   : > { %v170_v0 = vld [vmem:[%s835_s1 + $0x18] sm:$0xff]  ;;  %v674_v1 = vmov 0.0   ;;  %v169_v2 = vld [vmem:[%s835_s1 + $0x10] sm:$0xff]  ;;  %s163_s30 = scalar_select %p162_p10, %s722_s16, 1  ;;  %v168_v5 = vld [vmem:[%s835_s1 + $0x8] sm:$0xff]  ;;  %vm675_vm0 = vmmov 0  }
  0x14   : > { %534 = vmatprep.subr.mxu0 %v674_v1  ;;  %545 = vmatprep.subr.mxu1 %v674_v1  ;;  %v507_v3 = vld [vmem:[%s835_s1 + $0x38] sm:$0xff]  ;;  %v506_v4 = vld [vmem:[%s835_s1 + $0x30] sm:$0xff]  ;;  %v167_v6 = vld [vmem:[%s835_s1] sm:$0xff]  ;;  %vm171_vm1 = vcmask 261120   ;;  %vm411_vm2 = vcmask 130048   ;;  %vm422_vm3 = vcmask 392192  }
  0x15   : > { %535 = vmatpush3.msra.mxu0 %v170_v0  ;;  %546 = vmatpush3.msra.mxu1 %v507_v3  ;;  %s502_s8 = sshll.u32 %s163_s30, 3  ;;  %v505_v7 = vld [vmem:[%s835_s1 + $0x28] sm:$0xff]  ;;  %v512_v9 = vld [vmem:[%s835_s1 + $0x58] sm:$0xff]  ;;  %v504_v10 = vld [vmem:[%s835_s1 + $0x20] sm:$0xff] }
  0x16   : > { %536 = vmatprep.subr.mxu0 %v674_v1  ;;  %542 = vmatprep.mubr.msk.f32.mxu0 %vm675_vm0, %v674_v1  ;;  %s165_s11 = scalar_lea.vmem %s834_s0, %s502_s8  ;;  %v511_v11 = vld [vmem:[%s835_s1 + $0x50] sm:$0xff]  ;;  %v510_v12 = vld [vmem:[%s835_s1 + $0x48] sm:$0xff]  ;;  %v509_v13 = vld [vmem:[%s835_s1 + $0x40] sm:$0xff] }
  0x17   : > { %537 = vmatpush3.msra.mxu0 %v169_v2  ;;  %547 = vmatprep.subr.mxu1 %v674_v1  ;;  %v166_v8 = vld [vmem:[%s165_s11] sm:$0xff]  ;;  %s679_s11 = smov 32  }
  0x18   : > { %538 = vmatprep.subr.mxu0 %v674_v1  ;;  %548 = vmatpush3.msra.mxu1 %v506_v4  ;;  %v514_v23 = vld [vmem:[%s836_s2] ss:$0 sm:$0xff] }
  0x19   : > { %539 = vmatpush3.msra.mxu0 %v168_v5  ;;  %549 = vmatprep.subr.mxu1 %v674_v1 }
  0x1a   : > { %250 = vrot.lane.b32.xlu0 %v166_v8, %s676_s25  ;;  %540 = vmatprep.subr.mxu0 %v674_v1  ;;  %s516_s25 = sshll.u32 %s722_s16, 7  ;;  %s680_s16 = smov [#allocation2]  }
  0x1b   : > { %541 = vmatpush3.msra.mxu0 %v167_v6  ;;  %550 = vmatpush3.msra.mxu1 %v505_v7  ;;  %s436_s30 = scalar_lea.hbm %s837_s3, %s516_s25  ;;  %s616_s6 = sshll.u32 %s680_s16, 4  ;;  %s617_s6 = int_to_ptr.vmem [resolvable:$false] %s616_s6 }
  0x1c   : > { %543 = vmatmul.mubr.msk.f32.vlgmr.msra.gmra.mxu0 %vm171_vm1, %v166_v8  ;;  %556 = vmatprep.subr.mxu0 %v674_v1  ;;  %s618_s7 = scalar_lea.vmem %s617_s6, 256  ;;  %p619_p0 = scmp.lt.s32.totalorder %s439_s27, %s617_s6 }
  0x1d   : > { %557 = vmatpush3.msra.mxu0 %v512_v9  ;;  %551 = vmatprep.subr.mxu1 %v674_v1 }
  0x1e   : > { %329 = vrot.lane.b32.xlu0 %v166_v8, %s677_s5  ;;  %558 = vmatprep.subr.mxu0 %v674_v1  ;;  %s612_s5 = scalar_lea.vmem %s439_s27, 128 }
  0x1f   : > { %552 = vmatpush3.msra.mxu1 %v504_v10  ;;  %553 = vmatprep.mubr.msk.f32.mxu1 %vm675_vm0, %v674_v1  ;;  %p613_p11 = scmp.ne.s32.totalorder %s439_s27, %s612_s5  ;;  %p620_p1 = scmp.lt.s32.totalorder %s618_s7, %s612_s5 }
  0x20   : > { %559 = vmatpush3.msra.mxu0 %v511_v11  ;;  %564 = vmatprep.mubr.msk.f32.mxu0 %vm675_vm0, %v674_v1 }
  0x21   : > { %560 = vmatprep.subr.mxu0 %v674_v1  ;;  %p614_p12 = pnand %p613_p11, %p739_p5  ;;  %p621_p2 = por %p620_p1, %p619_p0 }
  0x22   : > { %561 = vmatpush3.msra.mxu0 %v510_v12 }
  0x23   : > { %562 = vmatprep.subr.mxu0 %v674_v1  ;;  %p615_p13 = pneg %p614_p12 }
  0x24   : > { %563 = vmatpush3.msra.mxu0 %v509_v13 }
  0x25   : > { %p622_p3 = pnand %p621_p2, %p615_p13 }
  0x8c   : > { %v251_v14 = vpop.permute.xlu0 %250 }
  0x8d   : > { %554 = vmatmul.mubr.msk.f32.vlgmr.msra.gmra.mxu1 %vm171_vm1, %v251_v14 }
  0x90   : > { %v330_v15 = vpop.permute.xlu0 %329 }
  0x91   : > { %565 = vmatmul.mubr.msk.f32.vlgmr.msra.gmra.mxu0 %vm171_vm1, %v330_v15 }
  0xdc   : > { %v241_v16 = vpop.f32.mrf.mxu0 }
  0xde   : > { %v544_v17 = vpop.f32.mrf.mxu0 }
 0x14d   : > { %v320_v18 = vpop.f32.mrf.mxu1 }
 0x14e   : > { %404 = vrot.lane.b32.xlu1 %v320_v18, %s678_s10 }
 0x14f   : > { %v555_v19 = vpop.f32.mrf.mxu1 }
 0x151   : > { %v399_v20 = vpop.f32.mrf.mxu0 }
 0x152   : > { %408 = vrot.lane.b32.xlu1 %v399_v20, %s679_s11 }
 0x153   : > { %v566_v21 = vpop.f32.mrf.mxu0 }
 0x1c0   : > { %v405_v22 = vpop.permute.xlu1 %404 }
 0x1c1   : > { %v412_v24 = vsel %vm411_vm2, %v241_v16, %v405_v22 }
 0x1c4   : > { %v409_v25 = vpop.permute.xlu1 %408 }
 0x1c5   : > { %v413_v26 = vsel %vm171_vm1, %v412_v24, %v409_v25 }
 0x1c6   : > { %v421_v27 = vadd.f32 %v514_v23, %v413_v26 }
 0x1c8   : > { %423 = vst.msk [vmem:[%s161_s26] sm:$0xff] %vm422_vm3, %v421_v27 }
 0x1c9   : > { %625 = shalt.err (!%p622_p3)
}
 0x1ca   : > { %s626_s8 = scalar_lea.hbm %s436_s30, 128  ;;  %s630_s11 = scalar_lea.hbm %s837_s3, 256 }
 0x1cb   : > { %p627_p4 = scmp.ne.s32.totalorder %s436_s30, %s626_s8  ;;  %p631_p9 = scmp.lt.s32.totalorder %s436_s30, %s837_s3 }
 0x1cc   : > { %p632_p10 = scmp.lt.s32.totalorder %s630_s11, %s626_s8 }
 0x1cd   : > { %p628_p7 = pnand %p627_p4, %p739_p5 }
 0x1ce   : > { %p633_p11 = por %p632_p10, %p631_p9 }
 0x1cf   : > { %p629_p8 = pneg %p628_p7 }
 0x1d1   : > { %p634_p12 = pnand %p633_p11, %p629_p8 }
 0x1d3   : > { %637 = shalt.err (!%p634_p12)
}
 0x1d4   : > { %567 = dma.vmem_to_hbm [thread:$0]  (%p739_p5), %s439_s27, 128, %s436_s30, %s425_s4  }
 0x1d5 PF: > { %p573_p13 = scmp.ge.s32.totalorder %s672_s15, 2  ;;  %s450_s20 = sand.u32 1, %s660_s12  }
 0x1d6   : > { %s451_s24 = scalar_lea.sflag [#allocation3], %s450_s20 }
 0x1d7   : > { %p570_p0 = pnand %p573_p13, %p743_p6 }
 0x1d9   : > { %p571_p1 = pneg %p570_p0 }
 0x1db   : > { %655 = dma.done.wait (%p571_p1), %s451_s24, 128  }
 0x1dc   : > { %657 = vsyncadd (%p571_p1), %s451_s24, 4294967168  ;;  %p13_p2 = scmp.ge.s32.totalorder %s726_s18, 4   ;;  %s840_s12 = smov %s664_s13 }
 0x1dd   : > { %s841_s13 = smov %s668_s14  ;;  %s842_s14 = smov %s737_s21 }
 0x1de   : > { %s843_s15 = smov %s726_s18  ;;  %15 = sbr.rel (!%p13_p2) target bundleno = 3 (0x3), region = 69 }
 0x1e3   :  { %456 = vsyncpa [#allocation3], 1 }
 0x1e4   :  { %458 = vsyncpa [#allocation3 + $0x1], 1 }

</bundles_post_ra>
